<compile_context>
chip_gen: v5e
topology: v5e:2x2
jax: 0.10.0
libtpu: 0.0.40
codegen_flags: <defaults>
</compile_context>

<pallas_src>
import functools

import jax
import jax.numpy as jnp
from jax.experimental import pallas as pl
from jax.experimental.pallas import tpu as pltpu


def _round_up(x, m):
    return (x + m - 1) // m * m


def _mog_kernel(x_ref, w_ref, b_ref, probs_ref, mu_ref, logsig_ref, *,
                CKp, Cp, K):
    """Fused y = x @ W + b for all three heads + per-channel softmax on pi.

    x_ref:   (tb, H)            input rows (cast to bf16 in-kernel)
    w_ref:   (H, 2*CKp + K*Cp)  bf16, columns = [mu | log_sig | pi]
                                pi is component-major: col = k*Cp + c
    b_ref:   (1, 2*CKp + K*Cp)  f32 bias
    probs_ref: (K, tb, Cp)      softmax(pi), one lane-dense slab per component
    mu_ref / logsig_ref: (tb, CKp)  lane-dense bf16 slabs
    """
    x = x_ref[...].astype(jnp.bfloat16)
    # One MXU matmul for all three heads (bf16 in, f32 accumulate).
    y = jnp.dot(x, w_ref[...], preferred_element_type=jnp.float32)
    y = y + b_ref[...]

    # Head slices start on 128-lane boundaries (CKp % 128 == 0, Cp % 128 == 0).
    mu_ref[...] = y[:, 0 * CKp:1 * CKp].astype(mu_ref.dtype)
    logsig_ref[...] = y[:, 1 * CKp:2 * CKp].astype(logsig_ref.dtype)

    # Lane-dense per-channel softmax over the K mixture components: component
    # k of every channel is the (tb, Cp) slice starting at column 2*CKp + k*Cp.
    # K-way unrolled max / exp / add -> pure VPU/EUP work, no reshape/relayout.
    base = 2 * CKp
    comp = [y[:, base + k * Cp: base + (k + 1) * Cp] for k in range(K)]
    m = comp[0]
    for k in range(1, K):
        m = jnp.maximum(m, comp[k])
    e = [jnp.exp(comp[k] - m) for k in range(K)]
    denom = e[0]
    for k in range(1, K):
        denom = denom + e[k]
    inv = 1.0 / denom  # exact divide: rows sum to 1 up to f32/bf16 rounding
    for k in range(K):
        probs_ref[k] = (e[k] * inv).astype(probs_ref.dtype)


def prepare_params(w_mu, b_mu, w_sig, b_sig, w_pi, b_pi,
                   hid_dim, input_channel, n_components):
    """Pack the three PyTorch-style Linear heads into one padded bf16 weight.

    Column layout (built once, outside the forward path):
      [ mu : CKp cols, channel-major (c*K + k), zero-padded to 128      |
        sig: CKp cols, same                                             |
        pi : K*Cp cols, component-major (k*Cp + c), Cp = round_up(C,128) ]
    """
    C, K = input_channel, n_components
    CK = C * K
    CKp = _round_up(CK, 128)
    Cp = _round_up(C, 128)

    def head(w, b):  # PyTorch (CK, H) -> (H, CKp) zero padded; bias (CKp,)
        wt = jnp.zeros((hid_dim, CKp), jnp.float32)
        wt = wt.at[:, :CK].set(w.astype(jnp.float32).T)
        bt = jnp.zeros((CKp,), jnp.float32).at[:CK].set(b.astype(jnp.float32))
        return wt, bt

    w_m, b_m = head(w_mu, b_mu)
    w_s, b_s = head(w_sig, b_sig)

    # pi head: reorder channel-major (c*K + k) -> component-major (k*Cp + c).
    wp = w_pi.astype(jnp.float32).T.reshape(hid_dim, C, K)   # (H, C, K)
    wp = jnp.transpose(wp, (0, 2, 1))                        # (H, K, C)
    w_p = jnp.zeros((hid_dim, K, Cp), jnp.float32).at[:, :, :C].set(wp)
    w_p = w_p.reshape(hid_dim, K * Cp)
    bp = b_pi.astype(jnp.float32).reshape(C, K).T             # (K, C)
    b_p = jnp.zeros((K, Cp), jnp.float32).at[:, :C].set(bp).reshape(K * Cp)

    W = jnp.concatenate([w_m, w_s, w_p], axis=1).astype(jnp.bfloat16)
    b = jnp.concatenate([b_m, b_s, b_p]).reshape(1, -1)
    return W, b


def _pick_tb(B):
    # Never fall back to tb = B: keep multiple grid steps once B is large
    # enough (pipelining + v7x megacore); small batches stay single-step.
    if B < 128:
        return max(8, _round_up(B, 8))
    if B < 1024:
        return 128      # also the 128x128 MXU sweet spot on v5e
    if B < 4096:
        return 256
    return 512


@functools.partial(
    jax.jit, static_argnames=("input_channel", "n_components", "out_dtype"))
def mixture_gaussian_fused(x, W, b, *, input_channel, n_components,
                           out_dtype=jnp.bfloat16):
    """x: (B, hid_dim); W, b from prepare_params.

    Returns (logits, mu, log_sig), each (B, C, K), matching the PyTorch
    forward (logits = softmax over the component axis).
    """
    B, H = x.shape
    C, K = input_channel, n_components
    CK = C * K
    CKp = _round_up(CK, 128)
    Cp = _round_up(C, 128)
    Ntot = 2 * CKp + K * Cp
    assert W.shape == (H, Ntot) and b.shape == (1, Ntot)

    tb = _pick_tb(B)
    Bp = _round_up(B, tb)
    xp = x if Bp == B else jnp.pad(x, ((0, Bp - B), (0, 0)))

    kernel = functools.partial(_mog_kernel, CKp=CKp, Cp=Cp, K=K)

    out_shape = (
        jax.ShapeDtypeStruct((K, Bp, Cp), out_dtype),   # softmax(pi)
        jax.ShapeDtypeStruct((Bp, CKp), out_dtype),     # mu
        jax.ShapeDtypeStruct((Bp, CKp), out_dtype),     # log_sig
    )

    # VMEM budget from the actual block sizes (x + outputs double-buffered,
    # weight/bias resident), clamped to the 64 MiB v7x physical VMEM.
    # TODO(synk): single-buffer the grid-invariant W/b (pipeline_mode
    # Buffered(1)) and add a head-column grid axis when H*Ntot stops fitting
    # half of v7x VMEM.
    osz = jnp.dtype(out_dtype).itemsize
    vmem_est = (2 * tb * H * x.dtype.itemsize
                + 2 * (H * Ntot * 2 + Ntot * 4)
                + 2 * tb * (K * Cp + 2 * CKp) * osz)
    vmem_limit = min(64 * 1024 * 1024,
                     max(32 * 1024 * 1024, int(1.5 * vmem_est)))

    grid_spec = pltpu.PrefetchScalarGridSpec(
        num_scalar_prefetch=0,
        grid=(Bp // tb,),
        in_specs=[
            pl.BlockSpec((tb, H), lambda i: (i, 0)),       # H = full dim
            pl.BlockSpec((H, Ntot), lambda i: (0, 0)),     # resident weight
            pl.BlockSpec((1, Ntot), lambda i: (0, 0)),     # resident bias
        ],
        out_specs=[
            pl.BlockSpec((K, tb, Cp), lambda i: (0, i, 0)),
            pl.BlockSpec((tb, CKp), lambda i: (i, 0)),
            pl.BlockSpec((tb, CKp), lambda i: (i, 0)),
        ],
    )

    probs, mu, log_sig = pl.pallas_call(
        kernel,
        out_shape=out_shape,
        grid_spec=grid_spec,
        compiler_params=pltpu.CompilerParams(
            dimension_semantics=("parallel",),
            vmem_limit_bytes=vmem_limit,
        ),
    )(xp, W, b)

    # Padding strip + reshape to the PyTorch (B, C, K) layout.  Cheap now
    # (bf16, minimal padding); consumers that accept padded slabs can skip it.
    logits = jnp.transpose(probs[:, :B, :C], (1, 2, 0))   # (B, C, K)
    mu = mu[:B, :CK].reshape(B, C, K)
    log_sig = log_sig[:B, :CK].reshape(B, C, K)
    return logits, mu, log_sig


def mixture_gaussian(x, w_mu, b_mu, w_sig, b_sig, w_pi, b_pi,
                     input_channel, n_components):
    """Convenience one-shot wrapper (param prep + fused forward)."""
    W, b = prepare_params(w_mu, b_mu, w_sig, b_sig, w_pi, b_pi,
                          x.shape[1], input_channel, n_components)
    return mixture_gaussian_fused(
        x, W, b, input_channel=input_channel, n_components=n_components)


def _reference(x, w_mu, b_mu, w_sig, b_sig, w_pi, b_pi, C, K):
    """Pure-JAX reference of the PyTorch forward (same bf16 matmul inputs)."""
    B = x.shape[0]
    xb = x.astype(jnp.bfloat16)

    def head(w, bb):
        y = jnp.dot(xb, w.T.astype(jnp.bfloat16),
                    preferred_element_type=jnp.float32) + bb
        return y.reshape(B, C, K)

    mu = head(w_mu, b_mu)
    log_sig = head(w_sig, b_sig)
    pi = head(w_pi, b_pi)
    return jax.nn.softmax(pi, axis=-1), mu, log_sig


if __name__ == "__main__":
    # Small, deterministic config consistent with the module's __init__.
    hid_dim = 32
    input_channel = 4
    n_components = 8
    batch = 8
    CK = input_channel * n_components

    key = jax.random.PRNGKey(0)
    kx, kwm, kbm, kws, kbs, kwp, kbp = jax.random.split(key, 7)

    x = jax.random.normal(kx, (batch, hid_dim), dtype=jnp.float32)

    # nn.Linear-style init: U(-1/sqrt(in), 1/sqrt(in)), weight shape (out, in).
    bound = 1.0 / (hid_dim ** 0.5)
    u = lambda k, s: jax.random.uniform(k, s, jnp.float32, -bound, bound)
    w_mu, b_mu = u(kwm, (CK, hid_dim)), u(kbm, (CK,))
    w_sig, b_sig = u(kws, (CK, hid_dim)), u(kbs, (CK,))
    w_pi, b_pi = u(kwp, (CK, hid_dim)), u(kbp, (CK,))

    # Param packing hoisted out of the forward call (done once).
    W, b = prepare_params(w_mu, b_mu, w_sig, b_sig, w_pi, b_pi,
                          hid_dim, input_channel, n_components)

    logits, mu, log_sig = mixture_gaussian_fused(
        x, W, b, input_channel=input_channel, n_components=n_components)
    jax.block_until_ready((logits, mu, log_sig))

    ref_logits, ref_mu, ref_log_sig = _reference(
        x, w_mu, b_mu, w_sig, b_sig, w_pi, b_pi, input_channel, n_components)

    assert logits.shape == (batch, input_channel, n_components)
    assert mu.shape == (batch, input_channel, n_components)
    assert log_sig.shape == (batch, input_channel, n_components)

    # bf16 outputs: compare in f32 with bf16 store-rounding tolerances.
    mu32 = mu.astype(jnp.float32)
    ls32 = log_sig.astype(jnp.float32)
    lg32 = logits.astype(jnp.float32)
    assert jnp.allclose(mu32, ref_mu, atol=2e-2, rtol=2e-2)
    assert jnp.allclose(ls32, ref_log_sig, atol=2e-2, rtol=2e-2)
    assert jnp.allclose(lg32, ref_logits, atol=1e-2, rtol=1e-2)
    # Exact f32 normalization in-kernel; only bf16 store rounding remains.
    assert jnp.allclose(jnp.sum(lg32, axis=-1), 1.0, atol=5e-3)

    print("KERNEL_OK")
</pallas_src>

<mosaic_0001>
module attributes {stable_mosaic.version = 11 : i64} {
  func.func @_mog_kernel(%arg0: i32, %arg1: memref<8x32xf32, #tpu.memory_space<vmem>>, %arg2: memref<32x1280xbf16, #tpu.memory_space<vmem>>, %arg3: memref<1x1280xf32, #tpu.memory_space<vmem>>, %arg4: memref<8x8x128xbf16, #tpu.memory_space<vmem>>, %arg5: memref<8x128xbf16, #tpu.memory_space<vmem>>, %arg6: memref<8x128xbf16, #tpu.memory_space<vmem>>) attributes {dimension_semantics = [#tpu.dimension_semantics<parallel>], iteration_bounds = array<i64: 1>, scalar_prefetch = 0 : i64, scratch_operands = 0 : i64, tpu.core_type = #tpu.core_type<tc>, window_params = [{transform_indices = @transform_0, window_bounds = array<i64: 8, 32>}, {pipeline_mode = #tpu.pipeline_mode<synchronous>, transform_indices = @transform_1, window_bounds = array<i64: 32, 1280>}, {pipeline_mode = #tpu.pipeline_mode<synchronous>, transform_indices = @transform_2, window_bounds = array<i64: 1, 1280>}, {transform_indices = @transform_3, window_bounds = array<i64: 8, 8, 128>}, {transform_indices = @transform_4, window_bounds = array<i64: 8, 128>}, {transform_indices = @transform_5, window_bounds = array<i64: 8, 128>}]} {
    %c0 = arith.constant 0 : index
    %c0_0 = arith.constant 0 : index
    %0 = vector.load %arg1[%c0, %c0_0] : memref<8x32xf32, #tpu.memory_space<vmem>>, vector<8x32xf32>
    %1 = arith.truncf %0 : vector<8x32xf32> to vector<8x32xbf16>
    %c0_1 = arith.constant 0 : index
    %c0_2 = arith.constant 0 : index
    %2 = vector.load %arg2[%c0_1, %c0_2] : memref<32x1280xbf16, #tpu.memory_space<vmem>>, vector<32x1280xbf16>
    %cst = arith.constant dense<0.000000e+00> : vector<8x1280xf32>
    %3 = tpu.matmul %1, %2, %cst {dimension_numbers = #tpu.dot_dimension_numbers<[1], [0], [0], [1], [0, 0, 1, 1], [], []>} : vector<8x32xbf16>, vector<32x1280xbf16>, vector<8x1280xf32> -> vector<8x1280xf32>
    %c0_3 = arith.constant 0 : index
    %c0_4 = arith.constant 0 : index
    %4 = vector.load %arg3[%c0_3, %c0_4] : memref<1x1280xf32, #tpu.memory_space<vmem>>, vector<1x1280xf32>
    %5 = vector.broadcast %4 : vector<1x1280xf32> to vector<8x1280xf32>
    %6 = arith.addf %3, %5 : vector<8x1280xf32>
    %7 = vector.extract_strided_slice %6 {offsets = [0, 0], sizes = [8, 128], strides = [1, 1]} : vector<8x1280xf32> to vector<8x128xf32>
    %8 = arith.truncf %7 : vector<8x128xf32> to vector<8x128xbf16>
    %c0_5 = arith.constant 0 : index
    %c0_6 = arith.constant 0 : index
    %9 = vector.load %arg5[%c0_5, %c0_6] : memref<8x128xbf16, #tpu.memory_space<vmem>>, vector<8x128xbf16>
    tpu.vector_store %arg5[%c0_5, %c0_6], %8 {strides = array<i32>} : memref<8x128xbf16, #tpu.memory_space<vmem>>, vector<8x128xbf16>,
    %10 = vector.extract_strided_slice %6 {offsets = [0, 128], sizes = [8, 128], strides = [1, 1]} : vector<8x1280xf32> to vector<8x128xf32>
    %11 = arith.truncf %10 : vector<8x128xf32> to vector<8x128xbf16>
    %c0_7 = arith.constant 0 : index
    %c0_8 = arith.constant 0 : index
    %12 = vector.load %arg6[%c0_7, %c0_8] : memref<8x128xbf16, #tpu.memory_space<vmem>>, vector<8x128xbf16>
    tpu.vector_store %arg6[%c0_7, %c0_8], %11 {strides = array<i32>} : memref<8x128xbf16, #tpu.memory_space<vmem>>, vector<8x128xbf16>,
    %13 = vector.extract_strided_slice %6 {offsets = [0, 256], sizes = [8, 128], strides = [1, 1]} : vector<8x1280xf32> to vector<8x128xf32>
    %14 = vector.extract_strided_slice %6 {offsets = [0, 384], sizes = [8, 128], strides = [1, 1]} : vector<8x1280xf32> to vector<8x128xf32>
    %15 = vector.extract_strided_slice %6 {offsets = [0, 512], sizes = [8, 128], strides = [1, 1]} : vector<8x1280xf32> to vector<8x128xf32>
    %16 = vector.extract_strided_slice %6 {offsets = [0, 640], sizes = [8, 128], strides = [1, 1]} : vector<8x1280xf32> to vector<8x128xf32>
    %17 = vector.extract_strided_slice %6 {offsets = [0, 768], sizes = [8, 128], strides = [1, 1]} : vector<8x1280xf32> to vector<8x128xf32>
    %18 = vector.extract_strided_slice %6 {offsets = [0, 896], sizes = [8, 128], strides = [1, 1]} : vector<8x1280xf32> to vector<8x128xf32>
    %19 = vector.extract_strided_slice %6 {offsets = [0, 1024], sizes = [8, 128], strides = [1, 1]} : vector<8x1280xf32> to vector<8x128xf32>
    %20 = vector.extract_strided_slice %6 {offsets = [0, 1152], sizes = [8, 128], strides = [1, 1]} : vector<8x1280xf32> to vector<8x128xf32>
    %21 = arith.maximumf %13, %14 : vector<8x128xf32>
    %22 = arith.maximumf %21, %15 : vector<8x128xf32>
    %23 = arith.maximumf %22, %16 : vector<8x128xf32>
    %24 = arith.maximumf %23, %17 : vector<8x128xf32>
    %25 = arith.maximumf %24, %18 : vector<8x128xf32>
    %26 = arith.maximumf %25, %19 : vector<8x128xf32>
    %27 = arith.maximumf %26, %20 : vector<8x128xf32>
    %28 = arith.subf %13, %27 : vector<8x128xf32>
    %29 = math.exp %28 : vector<8x128xf32>
    %30 = arith.subf %14, %27 : vector<8x128xf32>
    %31 = math.exp %30 : vector<8x128xf32>
    %32 = arith.subf %15, %27 : vector<8x128xf32>
    %33 = math.exp %32 : vector<8x128xf32>
    %34 = arith.subf %16, %27 : vector<8x128xf32>
    %35 = math.exp %34 : vector<8x128xf32>
    %36 = arith.subf %17, %27 : vector<8x128xf32>
    %37 = math.exp %36 : vector<8x128xf32>
    %38 = arith.subf %18, %27 : vector<8x128xf32>
    %39 = math.exp %38 : vector<8x128xf32>
    %40 = arith.subf %19, %27 : vector<8x128xf32>
    %41 = math.exp %40 : vector<8x128xf32>
    %42 = arith.subf %20, %27 : vector<8x128xf32>
    %43 = math.exp %42 : vector<8x128xf32>
    %44 = arith.addf %29, %31 : vector<8x128xf32>
    %45 = arith.addf %44, %33 : vector<8x128xf32>
    %46 = arith.addf %45, %35 : vector<8x128xf32>
    %47 = arith.addf %46, %37 : vector<8x128xf32>
    %48 = arith.addf %47, %39 : vector<8x128xf32>
    %49 = arith.addf %48, %41 : vector<8x128xf32>
    %50 = arith.addf %49, %43 : vector<8x128xf32>
    %cst_9 = arith.constant 1.000000e+00 : f32
    %51 = vector.broadcast %cst_9 : f32 to vector<8x128xf32>
    %52 = arith.divf %51, %50 : vector<8x128xf32>
    %53 = arith.mulf %29, %52 : vector<8x128xf32>
    %54 = arith.truncf %53 : vector<8x128xf32> to vector<8x128xbf16>
    %c0_10 = arith.constant 0 : index
    %c0_11 = arith.constant 0 : index
    %c0_12 = arith.constant 0 : index
    %55 = vector.load %arg4[%c0_10, %c0_11, %c0_12] : memref<8x8x128xbf16, #tpu.memory_space<vmem>>, vector<1x8x128xbf16>
    %56 = vector.shape_cast %55 : vector<1x8x128xbf16> to vector<8x128xbf16>
    %57 = vector.shape_cast %54 : vector<8x128xbf16> to vector<1x8x128xbf16>
    tpu.vector_store %arg4[%c0_10, %c0_11, %c0_12], %57 {strides = array<i32>} : memref<8x8x128xbf16, #tpu.memory_space<vmem>>, vector<1x8x128xbf16>,
    %58 = arith.mulf %31, %52 : vector<8x128xf32>
    %59 = arith.truncf %58 : vector<8x128xf32> to vector<8x128xbf16>
    %c1 = arith.constant 1 : index
    %c0_13 = arith.constant 0 : index
    %c0_14 = arith.constant 0 : index
    %60 = vector.load %arg4[%c1, %c0_13, %c0_14] : memref<8x8x128xbf16, #tpu.memory_space<vmem>>, vector<1x8x128xbf16>
    %61 = vector.shape_cast %60 : vector<1x8x128xbf16> to vector<8x128xbf16>
    %62 = vector.shape_cast %59 : vector<8x128xbf16> to vector<1x8x128xbf16>
    tpu.vector_store %arg4[%c1, %c0_13, %c0_14], %62 {strides = array<i32>} : memref<8x8x128xbf16, #tpu.memory_space<vmem>>, vector<1x8x128xbf16>,
    %63 = arith.mulf %33, %52 : vector<8x128xf32>
    %64 = arith.truncf %63 : vector<8x128xf32> to vector<8x128xbf16>
    %c2 = arith.constant 2 : index
    %c0_15 = arith.constant 0 : index
    %c0_16 = arith.constant 0 : index
    %65 = vector.load %arg4[%c2, %c0_15, %c0_16] : memref<8x8x128xbf16, #tpu.memory_space<vmem>>, vector<1x8x128xbf16>
    %66 = vector.shape_cast %65 : vector<1x8x128xbf16> to vector<8x128xbf16>
    %67 = vector.shape_cast %64 : vector<8x128xbf16> to vector<1x8x128xbf16>
    tpu.vector_store %arg4[%c2, %c0_15, %c0_16], %67 {strides = array<i32>} : memref<8x8x128xbf16, #tpu.memory_space<vmem>>, vector<1x8x128xbf16>,
    %68 = arith.mulf %35, %52 : vector<8x128xf32>
    %69 = arith.truncf %68 : vector<8x128xf32> to vector<8x128xbf16>
    %c3 = arith.constant 3 : index
    %c0_17 = arith.constant 0 : index
    %c0_18 = arith.constant 0 : index
    %70 = vector.load %arg4[%c3, %c0_17, %c0_18] : memref<8x8x128xbf16, #tpu.memory_space<vmem>>, vector<1x8x128xbf16>
    %71 = vector.shape_cast %70 : vector<1x8x128xbf16> to vector<8x128xbf16>
    %72 = vector.shape_cast %69 : vector<8x128xbf16> to vector<1x8x128xbf16>
    tpu.vector_store %arg4[%c3, %c0_17, %c0_18], %72 {strides = array<i32>} : memref<8x8x128xbf16, #tpu.memory_space<vmem>>, vector<1x8x128xbf16>,
    %73 = arith.mulf %37, %52 : vector<8x128xf32>
    %74 = arith.truncf %73 : vector<8x128xf32> to vector<8x128xbf16>
    %c4 = arith.constant 4 : index
    %c0_19 = arith.constant 0 : index
    %c0_20 = arith.constant 0 : index
    %75 = vector.load %arg4[%c4, %c0_19, %c0_20] : memref<8x8x128xbf16, #tpu.memory_space<vmem>>, vector<1x8x128xbf16>
    %76 = vector.shape_cast %75 : vector<1x8x128xbf16> to vector<8x128xbf16>
    %77 = vector.shape_cast %74 : vector<8x128xbf16> to vector<1x8x128xbf16>
    tpu.vector_store %arg4[%c4, %c0_19, %c0_20], %77 {strides = array<i32>} : memref<8x8x128xbf16, #tpu.memory_space<vmem>>, vector<1x8x128xbf16>,
    %78 = arith.mulf %39, %52 : vector<8x128xf32>
    %79 = arith.truncf %78 : vector<8x128xf32> to vector<8x128xbf16>
    %c5 = arith.constant 5 : index
    %c0_21 = arith.constant 0 : index
    %c0_22 = arith.constant 0 : index
    %80 = vector.load %arg4[%c5, %c0_21, %c0_22] : memref<8x8x128xbf16, #tpu.memory_space<vmem>>, vector<1x8x128xbf16>
    %81 = vector.shape_cast %80 : vector<1x8x128xbf16> to vector<8x128xbf16>
    %82 = vector.shape_cast %79 : vector<8x128xbf16> to vector<1x8x128xbf16>
    tpu.vector_store %arg4[%c5, %c0_21, %c0_22], %82 {strides = array<i32>} : memref<8x8x128xbf16, #tpu.memory_space<vmem>>, vector<1x8x128xbf16>,
    %83 = arith.mulf %41, %52 : vector<8x128xf32>
    %84 = arith.truncf %83 : vector<8x128xf32> to vector<8x128xbf16>
    %c6 = arith.constant 6 : index
    %c0_23 = arith.constant 0 : index
    %c0_24 = arith.constant 0 : index
    %85 = vector.load %arg4[%c6, %c0_23, %c0_24] : memref<8x8x128xbf16, #tpu.memory_space<vmem>>, vector<1x8x128xbf16>
    %86 = vector.shape_cast %85 : vector<1x8x128xbf16> to vector<8x128xbf16>
    %87 = vector.shape_cast %84 : vector<8x128xbf16> to vector<1x8x128xbf16>
    tpu.vector_store %arg4[%c6, %c0_23, %c0_24], %87 {strides = array<i32>} : memref<8x8x128xbf16, #tpu.memory_space<vmem>>, vector<1x8x128xbf16>,
    %88 = arith.mulf %43, %52 : vector<8x128xf32>
    %89 = arith.truncf %88 : vector<8x128xf32> to vector<8x128xbf16>
    %c7 = arith.constant 7 : index
    %c0_25 = arith.constant 0 : index
    %c0_26 = arith.constant 0 : index
    %90 = vector.load %arg4[%c7, %c0_25, %c0_26] : memref<8x8x128xbf16, #tpu.memory_space<vmem>>, vector<1x8x128xbf16>
    %91 = vector.shape_cast %90 : vector<1x8x128xbf16> to vector<8x128xbf16>
    %92 = vector.shape_cast %89 : vector<8x128xbf16> to vector<1x8x128xbf16>
    tpu.vector_store %arg4[%c7, %c0_25, %c0_26], %92 {strides = array<i32>} : memref<8x8x128xbf16, #tpu.memory_space<vmem>>, vector<1x8x128xbf16>,
    return
  }
  func.func @transform_0(%arg0: i32) -> (i32, i32) {
    %c0_i32 = arith.constant 0 : i32
    %c0_i32_0 = arith.constant 0 : i32
    return %arg0, %c0_i32 : i32, i32
  }
  func.func @transform_1(%arg0: i32) -> (i32, i32) {
    %c0_i32 = arith.constant 0 : i32
    %c0_i32_0 = arith.constant 0 : i32
    %c0_i32_1 = arith.constant 0 : i32
    return %c0_i32, %c0_i32_0 : i32, i32
  }
  func.func @transform_2(%arg0: i32) -> (i32, i32) {
    %c0_i32 = arith.constant 0 : i32
    %c0_i32_0 = arith.constant 0 : i32
    %c0_i32_1 = arith.constant 0 : i32
    return %c0_i32, %c0_i32_0 : i32, i32
  }
  func.func @transform_3(%arg0: i32) -> (i32, i32, i32) {
    %c0_i32 = arith.constant 0 : i32
    %c0_i32_0 = arith.constant 0 : i32
    %c0_i32_1 = arith.constant 0 : i32
    return %c0_i32, %arg0, %c0_i32_0 : i32, i32, i32
  }
  func.func @transform_4(%arg0: i32) -> (i32, i32) {
    %c0_i32 = arith.constant 0 : i32
    %c0_i32_0 = arith.constant 0 : i32
    return %arg0, %c0_i32 : i32, i32
  }
  func.func @transform_5(%arg0: i32) -> (i32, i32) {
    %c0_i32 = arith.constant 0 : i32
    %c0_i32_0 = arith.constant 0 : i32
    return %arg0, %c0_i32 : i32, i32
  }
}

</mosaic_0001>

<bundles_post_ra>
// kernel: mixture_gaussian_fused.1
= control target key start
LH: loop header
LB: loop body
LE: loop exit
PB: predicated region body
PF: predicated region fallthrough
CT: control target
= control target key end

     0   :  { %11 = vsyncpa [#allocation3], 0  ;;  %s754_s0 = inlined_call_operand.hbm [shape: f32[8,32], index: 0, kind: input, shape index: {}]   ;;  %s755_s1 = inlined_call_operand.hbm [shape: bf16[32,1280], index: 1, kind: input, shape index: {}]   ;;  %s756_s2 = inlined_call_operand.hbm [shape: f32[1,1280], index: 2, kind: input, shape index: {}]   ;;  %s757_s3 = inlined_call_operand.vmem [shape: bf16[8,8,128], index: 3, kind: output, shape index: {0}]   ;;  %s758_s4 = inlined_call_operand.vmem [shape: bf16[8,128], index: 4, kind: output, shape index: {1}]   ;;  %s759_s5 = inlined_call_operand.vmem [shape: bf16[8,128], index: 5, kind: output, shape index: {2}]  }
   0x1   :  { %12 = vsyncpa [#allocation5], 0  ;;  %s28_s20 = sshll.u32 %s755_s1, 4  ;;  %s682_s21 = smov [#allocation4]   ;;  %s29_s20 = int_to_ptr.hbm [resolvable:$true] %s28_s20 }
   0x2   :  { %s30_s22 = sshll.u32 %s682_s21, 4  ;;  %s18_s25 = sshll.u32 %s754_s0, 4  ;;  %s31_s22 = int_to_ptr.vmem [resolvable:$true] %s30_s22  ;;  %s19_s25 = int_to_ptr.hbm [resolvable:$true] %s18_s25 }
   0x3   :  { %s683_s26 = smov 640   ;;  %s684_s27 = smov 40  }
   0x4   :  { %36 = dma.hbm_to_vmem [thread:$0]  %s29_s20, 2560, %s31_s22, [#allocation5], %s683_s26, %s683_s26, %s684_s27  }
   0x5   :  { %s685_s28 = smov [#allocation2]   ;;  %s42_s7 = sshll.u32 %s756_s2, 4  ;;  %s43_s7 = int_to_ptr.hbm [resolvable:$true] %s42_s7 }
   0x6   :  { %s20_s29 = sshll.u32 %s685_s28, 4  ;;  %s686_s1 = smov [#allocation6]   ;;  %s21_s29 = int_to_ptr.vmem [resolvable:$true] %s20_s29 }
   0x7   :  { %23 = dma.hbm_to_vmem [thread:$0]  %s19_s25, 128, %s21_s29, [#allocation3]  }
   0x8   :  { %s44_s8 = sshll.u32 %s686_s1, 4  ;;  %s45_s8 = int_to_ptr.vmem [resolvable:$true] %s44_s8 }
   0x9   :  { %47 = dma.hbm_to_vmem [thread:$0]  %s43_s7, 160, %s45_s8, [#allocation5]  }
   0xa   :  { %678 = dma.done.wait [#allocation3], 128  }
   0xb   :  { %679 = vsyncadd [#allocation3], 4294967168 }
   0xc   :  { %680 = dma.done.wait [#allocation5], 2720  }
   0xd   :  { %681 = vsyncadd [#allocation5], 4294964576  ;;  %v485_v0 = vld [vmem:[#allocation4 + $0x50] sm:$0xf]  ;;  %v555_v1 = vld [vmem:[#allocation4 + $0x74] sm:$0xf0] }
   0xe   :  { %v550_v2 = vld [vmem:[#allocation4 + $0x54] sm:$0xf]  ;;  %v486_v3 = vor.u32 %v555_v1, %v485_v0  ;;  %v487_v4 = vld [vmem:[#allocation4 + $0x78] sm:$0xf0]  ;;  %v493_v5 = vld [vmem:[#allocation4 + $0x58] sm:$0xf] }
   0xf   :  { %v556_v6 = vld [vmem:[#allocation4 + $0x7c] sm:$0xf0]  ;;  %v490_v7 = vor.u32 %v550_v2, %v487_v4  ;;  %v551_v9 = vld [vmem:[#allocation4 + $0x5c] sm:$0xf]  ;;  %v495_v10 = vld [vmem:[#allocation4 + $0x80] sm:$0xf0] }
  0x10   :  { %v494_v8 = vor.u32 %v556_v6, %v493_v5  ;;  %v445_v11 = vld [vmem:[#allocation4] sm:$0xf]  ;;  %217 = vmatpush.bf16.msra.mxu0 %v486_v3  ;;  %v498_v12 = vor.u32 %v551_v9, %v495_v10  ;;  %v545_v13 = vld [vmem:[#allocation4 + $0x24] sm:$0xf0]  ;;  %v540_v14 = vld [vmem:[#allocation4 + $0x4] sm:$0xf] }
  0x11   :  { %v447_v15 = vld [vmem:[#allocation4 + $0x28] sm:$0xf0]  ;;  %230 = vmatpush.bf16.msra.mxu1 %v490_v7  ;;  %v446_v16 = vor.u32 %v545_v13, %v445_v11  ;;  %v453_v18 = vld [vmem:[#allocation4 + $0x8] sm:$0xf]  ;;  %v546_v19 = vld [vmem:[#allocation4 + $0x2c] sm:$0xf0] }
  0x12   :  { %243 = vmatpush.bf16.msra.mxu2 %v494_v8  ;;  %v450_v17 = vor.u32 %v540_v14, %v447_v15  ;;  %v541_v20 = vld [vmem:[#allocation4 + $0xc] sm:$0xf]  ;;  %256 = vmatpush.bf16.msra.mxu3 %v498_v12  ;;  %v454_v21 = vor.u32 %v546_v19, %v453_v18  ;;  %v455_v22 = vld [vmem:[#allocation4 + $0x30] sm:$0xf0]  ;;  %v61_v23 = vld [vmem:[#allocation2] sm:$0xff]  ;;  %vm207_vm0 = vcmask 261120  }
  0x13   :  { %v501_v24 = vld [vmem:[#allocation4 + $0x60] sm:$0xf]  ;;  %v458_v25 = vor.u32 %v541_v20, %v455_v22  ;;  %v62_v26 = vpack.c.bf16 %v61_v23, %v61_v23  ;;  %v557_v27 = vld [vmem:[#allocation4 + $0x84] sm:$0xf0]  ;;  %v552_v28 = vld [vmem:[#allocation4 + $0x64] sm:$0xf] }
  0x14   :  { %v503_v29 = vld [vmem:[#allocation4 + $0x88] sm:$0xf0]  ;;  %218 = vmatpush.bf16.msra.mxu0 %v446_v16  ;;  %v502_v30 = vor.u32 %v557_v27, %v501_v24  ;;  %v509_v32 = vld [vmem:[#allocation4 + $0x68] sm:$0xf]  ;;  %v558_v33 = vld [vmem:[#allocation4 + $0x8c] sm:$0xf0] }
  0x15   :  { %v506_v31 = vor.u32 %v552_v28, %v503_v29  ;;  %v461_v34 = vld [vmem:[#allocation4 + $0x10] sm:$0xf]  ;;  %231 = vmatpush.bf16.msra.mxu1 %v450_v17  ;;  %v510_v35 = vor.u32 %v558_v33, %v509_v32  ;;  %v547_v36 = vld [vmem:[#allocation4 + $0x34] sm:$0xf0]  ;;  %v553_v37 = vld [vmem:[#allocation4 + $0x6c] sm:$0xf] }
  0x16   :  { %244 = vmatpush.bf16.msra.mxu2 %v454_v21  ;;  %v511_v38 = vld [vmem:[#allocation4 + $0x90] sm:$0xf0]  ;;  %257 = vmatpush.bf16.msra.mxu3 %v458_v25  ;;  %v462_v39 = vor.u32 %v547_v36, %v461_v34  ;;  %v463_v42 = vld [vmem:[#allocation4 + $0x38] sm:$0xf0]  ;;  %v469_v43 = vld [vmem:[#allocation4 + $0x18] sm:$0xf] }
  0x17   :  { %v514_v40 = vor.u32 %v553_v37, %v511_v38  ;;  %v542_v41 = vld [vmem:[#allocation4 + $0x14] sm:$0xf]  ;;  %523 = vmatmul.msk.bf16.vlgmr.msra.gmra.mxu0 %vm207_vm0, %v62_v26  ;;  %v548_v45 = vld [vmem:[#allocation4 + $0x3c] sm:$0xf0]  ;;  %v543_v46 = vld [vmem:[#allocation4 + $0x1c] sm:$0xf] }
  0x18   :  { %269 = vmatpush.bf16.msrb.mxu0 %v502_v30  ;;  %v466_v44 = vor.u32 %v542_v41, %v463_v42  ;;  %v471_v47 = vld [vmem:[#allocation4 + $0x40] sm:$0xf0]  ;;  %524 = vmatmul.msk.bf16.vlgmr.msra.gmra.mxu1 %vm207_vm0, %v62_v26  ;;  %v517_v48 = vld [vmem:[#allocation4 + $0x70] sm:$0xf]  ;;  %v559_v49 = vld [vmem:[#allocation4 + $0x94] sm:$0xf0]  ;;  %v470_v51 = vor.u32 %v548_v45, %v469_v43 }
  0x19   :  { %282 = vmatpush.bf16.msrb.mxu1 %v506_v31  ;;  %525 = vmatmul.msk.bf16.vlgmr.msra.gmra.mxu2 %vm207_vm0, %v62_v26  ;;  %v554_v50 = vld [vmem:[#allocation4 + $0x74] sm:$0xf]  ;;  %v518_v52 = vor.u32 %v559_v49, %v517_v48  ;;  %v519_v53 = vld [vmem:[#allocation4 + $0x98] sm:$0xf0]  ;;  %v477_v54 = vld [vmem:[#allocation4 + $0x20] sm:$0xf]  ;;  %v474_v56 = vor.u32 %v543_v46, %v471_v47 }
  0x1a   :  { %526 = vmatmul.msk.bf16.vlgmr.msra.gmra.mxu3 %vm207_vm0, %v62_v26  ;;  %295 = vmatpush.bf16.msrb.mxu2 %v510_v35  ;;  %v549_v55 = vld [vmem:[#allocation4 + $0x44] sm:$0xf0]  ;;  %v522_v57 = vor.u32 %v554_v50, %v519_v53  ;;  %v544_v58 = vld [vmem:[#allocation4 + $0x24] sm:$0xf]  ;;  %v479_v59 = vld [vmem:[#allocation4 + $0x48] sm:$0xf0] }
  0x1b   :  { %308 = vmatpush.bf16.msrb.mxu3 %v514_v40  ;;  %v478_v60 = vor.u32 %v549_v55, %v477_v54  ;;  %v482_v61 = vor.u32 %v544_v58, %v479_v59  ;;  %v83_v62 = vld [vmem:[#allocation6] sm:$0xff]  ;;  %v84_v32 = vld [vmem:[#allocation6 + $0x8] sm:$0x3] }
  0x1c   :  { %270 = vmatpush.bf16.msrb.mxu0 %v462_v39  ;;  %v87_v63 = vperm.slane %v83_v62, 0  ;;  %v88_v0 = vperm.slane %v83_v62, 1  ;;  %v89_v11 = vperm.slane %v83_v62, 2  ;;  %v90_v12 = vperm.slane %v83_v62, 3 }
  0x1d   :  { %283 = vmatpush.bf16.msrb.mxu1 %v466_v44  ;;  %v91_v14 = vperm.slane %v83_v62, 4  ;;  %v92_v21 = vperm.slane %v83_v62, 5  ;;  %v93_v23 = vperm.slane %v83_v62, 6  ;;  %v94_v30 = vperm.slane %v83_v62, 7 }
  0x1e   :  { %296 = vmatpush.bf16.msrb.mxu2 %v470_v51  ;;  %v95_v36 = vperm.slane %v84_v32, 0  ;;  %v96_v37 = vperm.slane %v84_v32, 1 }
  0x1f   :  { %309 = vmatpush.bf16.msrb.mxu3 %v474_v56 }
  0x20   :  { %321 = vmatpush.bf16.msra.mxu0 %v518_v52 }
  0x21   :  { %334 = vmatpush.bf16.msra.mxu1 %v522_v57 }
  0x24   :  { %322 = vmatpush.bf16.msra.mxu0 %v478_v60 }
  0x25   :  { %335 = vmatpush.bf16.msra.mxu1 %v482_v61 }
  0x27   :  { %527 = vmatmul.msk.bf16.vlgmr.msrb.gmra.mxu0 %vm207_vm0, %v62_v26 }
  0x28   :  { %528 = vmatmul.msk.bf16.vlgmr.msrb.gmra.mxu1 %vm207_vm0, %v62_v26 }
  0x29   :  { %529 = vmatmul.msk.bf16.vlgmr.msrb.gmra.mxu2 %vm207_vm0, %v62_v26 }
  0x2a   :  { %530 = vmatmul.msk.bf16.vlgmr.msrb.gmra.mxu3 %vm207_vm0, %v62_v26 }
  0x37   :  { %531 = vmatmul.msk.bf16.vlgmr.msra.gmra.mxu0 %vm207_vm0, %v62_v26 }
  0x38   :  { %532 = vmatmul.msk.bf16.vlgmr.msra.gmra.mxu1 %vm207_vm0, %v62_v26 }
  0x94   :  { %v220_v1 = vpop.f32.mrf.mxu0 }
  0x95   :  { %v221_v2 = vadd.f32 %v220_v1, %v87_v63  ;;  %v233_v3 = vpop.f32.mrf.mxu1 }
  0x96   :  { %v234_v4 = vadd.f32 %v233_v3, %v88_v0 }
  0x97   :  { %v341_v5 = vpack.c.bf16 %v221_v2, %v221_v2 }
  0x98   :  { %v343_v6 = vpack.c.bf16 %v234_v4, %v234_v4 }
  0x99   :  { %342 = vst [vmem:[%s758_s4] sm:$0xf] %v341_v5 }
  0x9a   :  { %344 = vst [vmem:[%s759_s5] sm:$0xf] %v343_v6 }
  0x9c   :  { %v246_v7 = vpop.f32.mrf.mxu2  ;;  %v222_v9 = vpop.f32.mrf.mxu0 }
  0x9d   :  { %v259_v8 = vpop.f32.mrf.mxu3  ;;  %v235_v10 = vpop.f32.mrf.mxu1  ;;  %v247_v17 = vadd.f32 %v246_v7, %v89_v11 }
  0x9e   :  { %v260_v18 = vadd.f32 %v259_v8, %v90_v12 }
  0xa0   :  { %v345_v22 = vmax.f32 %v247_v17, %v260_v18 }
  0xa4   :  { %v248_v13 = vpop.f32.mrf.mxu2  ;;  %v272_v16 = vpop.f32.mrf.mxu0 }
  0xa5   :  { %v261_v15 = vpop.f32.mrf.mxu3  ;;  %v285_v19 = vpop.f32.mrf.mxu1  ;;  %v273_v20 = vadd.f32 %v272_v16, %v91_v14 }
  0xa6   :  { %v286_v25 = vadd.f32 %v285_v19, %v92_v21 }
  0xa7   :  { %v346_v24 = vmax.f32 %v345_v22, %v273_v20 }
  0xa9   :  { %v347_v33 = vmax.f32 %v346_v24, %v286_v25 }
  0xac   :  { %v298_v26 = vpop.f32.mrf.mxu2  ;;  %v274_v28 = vpop.f32.mrf.mxu0 }
  0xad   :  { %v311_v27 = vpop.f32.mrf.mxu3  ;;  %v299_v29 = vadd.f32 %v298_v26, %v93_v23  ;;  %v287_v31 = vpop.f32.mrf.mxu1 }
  0xae   :  { %v312_v35 = vadd.f32 %v311_v27, %v94_v30 }
  0xaf   :  { %v348_v34 = vmax.f32 %v347_v33, %v299_v29 }
  0xb1   :  { %v349_v41 = vmax.f32 %v348_v34, %v312_v35 }
  0xb4   :  { %v300_v38 = vpop.f32.mrf.mxu2  ;;  %v324_v40 = vpop.f32.mrf.mxu0 }
  0xb5   :  { %v313_v39 = vpop.f32.mrf.mxu3  ;;  %v325_v42 = vadd.f32 %v324_v40, %v95_v36  ;;  %v337_v43 = vpop.f32.mrf.mxu1 }
  0xb6   :  { %v338_v44 = vadd.f32 %v337_v43, %v96_v37 }
  0xb7   :  { %v350_v45 = vmax.f32 %v349_v41, %v325_v42 }
  0xb9   :  { %v351_v46 = vmax.f32 %v350_v45, %v338_v44 }
  0xbb   :  { %v352_v47 = vsub.f32 %v247_v17, %v351_v46  ;;  %v355_v48 = vsub.f32 %v260_v18, %v351_v46  ;;  %v358_v49 = vsub.f32 %v273_v20, %v351_v46  ;;  %v361_v50 = vsub.f32 %v286_v25, %v351_v46 }
  0xbc   :  { %v326_v51 = vpop.f32.mrf.mxu0  ;;  %v364_v56 = vsub.f32 %v299_v29, %v351_v46  ;;  %v367_v58 = vsub.f32 %v312_v35, %v351_v46  ;;  %v370_v60 = vsub.f32 %v325_v42, %v351_v46  ;;  %v373_v62 = vsub.f32 %v338_v44, %v351_v46 }
  0xbd   :  { %v353_v52 = vmul.f32 1.442695, %v352_v47  ;;  %v356_v53 = vmul.f32 1.442695, %v355_v48  ;;  %v339_v54 = vpop.f32.mrf.mxu1  ;;  %v359_v55 = vmul.f32 1.442695, %v358_v49 }
  0xbe   :  { %v362_v57 = vmul.f32 1.442695, %v361_v50  ;;  %v365_v59 = vmul.f32 1.442695, %v364_v56  ;;  %v368_v61 = vmul.f32 1.442695, %v367_v58 }
  0xbf   :  { %588 = vpow2.f32 %v353_v52  ;;  %v371_v1 = vmul.f32 1.442695, %v370_v60  ;;  %v374_v4 = vmul.f32 1.442695, %v373_v62 }
  0xc0   :  { %590 = vpow2.f32 %v356_v53 }
  0xc1   :  { %592 = vpow2.f32 %v359_v55 }
  0xc2   :  { %594 = vpow2.f32 %v362_v57 }
  0xc3   :  { %596 = vpow2.f32 %v365_v59 }
  0xc4   :  { %598 = vpow2.f32 %v368_v61 }
  0xc5   :  { %v589_v63 = vpop.eup %588  ;;  %600 = vpow2.f32 %v371_v1 }
  0xc6   :  { %v591_v0 = vpop.eup %590  ;;  %602 = vpow2.f32 %v374_v4 }
  0xc7   :  { %v376_v2 = vadd.f32 %v591_v0, %v589_v63  ;;  %v593_v3 = vpop.eup %592 }
  0xc8   :  { %v595_v6 = vpop.eup %594 }
  0xc9   :  { %v377_v5 = vadd.f32 %v593_v3, %v376_v2  ;;  %v597_v8 = vpop.eup %596 }
  0xca   :  { %v599_v10 = vpop.eup %598 }
  0xcb   :  { %v378_v7 = vadd.f32 %v595_v6, %v377_v5  ;;  %v601_v12 = vpop.eup %600 }
  0xcc   :  { %v603_v14 = vpop.eup %602 }
  0xcd   :  { %v379_v9 = vadd.f32 %v597_v8, %v378_v7 }
  0xcf   :  { %v380_v11 = vadd.f32 %v599_v10, %v379_v9 }
  0xd1   :  { %v381_v13 = vadd.f32 %v601_v12, %v380_v11 }
  0xd3   :  { %v382_v15 = vadd.f32 %v603_v14, %v381_v13 }
  0xd5   :  { %604 = vrcp.f32 %v382_v15  ;;  %v394_v19 = vand.u32 2147483648, %v382_v15  ;;  %v392_v21 = vand.u32 2147483647, %v382_v15  ;;  %vm388_vm2 = vweird.f32 %v382_v15 }
  0xd7   :  { %v395_v23 = vor.u32 1.1754944e-38, %v394_v19  ;;  %vm393_vm4 = vcmp.eq.f32.partialorder %v392_v21, 8.507059e+37 }
  0xdb   :  { %v605_v16 = vpop.eup %604 }
  0xdc   :  { %v384_v17 = vmul.f32 %v605_v16, %v382_v15  ;;  %vm389_vm1 = vweird.f32 %v605_v16 }
  0xdd   :  { %vm390_vm3 = vmor %vm388_vm2, %vm389_vm1 }
  0xde   :  { %v385_v18 = vsub.f32 1.0, %v384_v17 }
  0xe0   :  { %v386_v20 = vmul.f32 %v605_v16, %v385_v18 }
  0xe2   :  { %v387_v22 = vadd.f32 %v605_v16, %v386_v20 }
  0xe4   :  { %v391_v24 = vsel %vm390_vm3, %v605_v16, %v387_v22 }
  0xe5   :  { %v396_v25 = vsel %vm393_vm4, %v395_v23, %v391_v24 }
  0xe6   :  { %v398_v26 = vmul.f32 %v589_v63, %v396_v25  ;;  %v401_v27 = vmul.f32 %v591_v0, %v396_v25  ;;  %v405_v28 = vmul.f32 %v593_v3, %v396_v25  ;;  %v409_v29 = vmul.f32 %v595_v6, %v396_v25 }
  0xe7   :  { %v413_v30 = vmul.f32 %v597_v8, %v396_v25  ;;  %v417_v31 = vmul.f32 %v599_v10, %v396_v25  ;;  %v421_v32 = vmul.f32 %v601_v12, %v396_v25  ;;  %v425_v33 = vmul.f32 %v603_v14, %v396_v25 }
  0xe8   :  { %v563_v34 = vpack.c.bf16 %v401_v27, %v398_v26  ;;  %v568_v35 = vpack.c.bf16 %v409_v29, %v405_v28 }
  0xe9   :  { %v573_v36 = vpack.c.bf16 %v417_v31, %v413_v30  ;;  %v578_v37 = vpack.c.bf16 %v425_v33, %v421_v32 }
  0xea   :  { %564 = vst [vmem:[%s757_s3] sm:$0xff] %v563_v34  }
  0xeb   :  { %580 = vst [vmem:[%s757_s3 + $0x8] sm:$0xff] %v568_v35  }
  0xec   :  { %581 = vst [vmem:[%s757_s3 + $0x10] sm:$0xff] %v573_v36  }
  0xed   :  { %582 = vst [vmem:[%s757_s3 + $0x18] sm:$0xff] %v578_v37  }
  0xee   :  { %441 = vsyncpa [#allocation3], 1 }
  0xef   :  { %442 = vsyncpa [#allocation5], 1 }

</bundles_post_ra>
